<compile_context>
chip_gen: v6e
topology: v6e:2x2x1
jax: 0.10.0
libtpu: 0.0.40
codegen_flags: <defaults>
</compile_context>

<pallas_src>
import math

import jax
import jax.numpy as jnp
from jax.experimental import pallas as pl
from jax.experimental.pallas import tpu as pltpu

_INV_SQRT2 = 0.7071067811865476


def _erf(x):
    # Abramowitz & Stegun 7.1.26 rational approximation, |error| < 1.5e-7.
    # Built only from mul/add/div/exp (EUP exp, VPU rest) so it lowers on
    # v5e/v6e/v7x; Horner form keeps the VALU op count minimal.
    a1, a2, a3, a4, a5 = (0.254829592, -0.284496736, 1.421413741,
                          -1.453152027, 1.061405429)
    p = 0.3275911
    ax = jnp.abs(x)
    t = 1.0 / (1.0 + p * ax)
    poly = ((((a5 * t + a4) * t + a3) * t + a2) * t + a1) * t
    y = 1.0 - poly * jnp.exp(-ax * ax)
    return jnp.where(x < 0, -y, y)


def _gelu(x):
    # Exact-form GELU (PyTorch nn.GELU() default): 0.5 * x * (1 + erf(x/sqrt(2))).
    return 0.5 * x * (1.0 + _erf(x * _INV_SQRT2))


def _mlp_kernel(x_ref, w1_ref, b1_ref, w2_ref, b2_ref, o_ref, acc_ref):
    # x_ref:  (tile_m, E)     w1_ref: (E, tile_f)   b1_ref: (1, tile_f)
    # w2_ref: (tile_f, E)     b2_ref: (1, E)
    # o_ref:  (tile_m, E)     acc_ref: (tile_m, E) f32 scratch
    f = pl.program_id(1)

    @pl.when(f == 0)
    def _():
        # Fold b2 into the accumulator init: removes the zero-fill and the
        # epilogue add (+ the extra (tile_m, E) store it implied).
        acc_ref[...] = jnp.broadcast_to(b2_ref[...].astype(jnp.float32),
                                        acc_ref.shape)

    h = jnp.dot(x_ref[...], w1_ref[...], preferred_element_type=jnp.float32)
    h = _gelu(h + b1_ref[...].astype(jnp.float32))
    acc_ref[...] += jnp.dot(h.astype(w2_ref.dtype), w2_ref[...],
                            preferred_element_type=jnp.float32)

    @pl.when(f == pl.num_programs(1) - 1)
    def _():
        o_ref[...] = acc_ref[...].astype(o_ref.dtype)


def _round_up(n: int, m: int) -> int:
    return -(-n // m) * m


def _vmem_budget_bytes() -> int:
    """Generation-aware usable-VMEM budget (with headroom for Mosaic scratch)."""
    try:
        cap = int(pltpu.get_tpu_info().vmem_capacity_bytes)
    except Exception:
        cap = 64 * 1024 * 1024  # conservative fallback = v7x per-TensorCore VMEM
    return int(cap * 0.78)      # ~100 MiB on v5e/v6e, ~50 MiB on v7x


def _vmem_estimate(tile_m: int, tile_f: int, E: int,
                   x_bytes: int, w_bytes: int) -> int:
    io = 2 * 2 * tile_m * E * x_bytes          # x + out blocks, double-buffered
    weights = 2 * 2 * E * tile_f * w_bytes     # w1 + w2 blocks, double-buffered
    biases = 2 * (tile_f + E) * w_bytes        # b1 + b2 blocks
    acc = tile_m * E * 4                       # f32 accumulator scratch
    hidden = tile_m * tile_f * (4 + w_bytes)   # f32 gelu(h) + cast copy for 2nd dot
    return io + weights + biases + acc + hidden


def _choose_tiles(M: int, E: int, F: int, x_bytes: int, w_bytes: int,
                  budget: int) -> tuple[int, int, bool]:
    """Returns (tile_m, tile_f, weights_resident)."""
    M8 = _round_up(M, 8)
    cands = sorted({c for c in (512, 384, 256, 128, 64, 32, 16, 8, M8)
                    if c <= max(M8, 8)}, reverse=True)

    def pick_tile_m(tile_f):
        fitting = [c for c in cands
                   if _vmem_estimate(c, tile_f, E, x_bytes, w_bytes) <= budget]
        if not fitting:
            return None
        # Prefer the largest tile_m whose M-padding waste stays small;
        # otherwise minimize the padded row count.
        for c in fitting:
            if _round_up(M, c) - M <= max(M // 8, c // 8):
                return c
        return min(fitting, key=lambda c: (_round_up(M, c), -c))

    # 1) Prefer VMEM-resident weights (tile_f = F): w1/w2 index_maps become
    #    constant -> each weight matrix is DMA'd exactly once.
    tm = pick_tile_m(F)
    if tm is not None:
        return tm, F, True

    # 2) Otherwise stream weight chunks along F (keep F % tile_f == 0 so the
    #    reduction never sees padded garbage), with tile_m as large as fits.
    f_cands = [f for f in (4096, 2048, 1024, 512, 256, 128) if f <= F and F % f == 0]
    if not f_cands:
        f_cands = [F]
    for tf in f_cands:
        tm = pick_tile_m(tf)
        if tm is not None:
            return tm, tf, False
    return 8, f_cands[-1], False


def mlp_block(x: jax.Array, w1: jax.Array, b1: jax.Array,
              w2: jax.Array, b2: jax.Array, *,
              compute_dtype=None,
              tile_m: int | None = None, tile_f: int | None = None) -> jax.Array:
    """Fused MLP: gelu(x @ w1 + b1) @ w2 + b2 (exact erf GELU, like nn.GELU()).

    x: (..., E); w1: (E, F); b1: (F,); w2: (F, E); b2: (E,).
    compute_dtype: optional MXU operand dtype (e.g. jnp.bfloat16); accumulation
    stays f32 and the output keeps x's dtype.
    """
    orig_shape = x.shape
    out_dtype = x.dtype
    E = orig_shape[-1]
    F = w1.shape[1]
    assert w1.shape == (E, F) and w2.shape == (F, E)
    assert b1.shape == (F,) and b2.shape == (E,)

    M = math.prod(orig_shape[:-1]) if len(orig_shape) > 1 else 1
    x2 = x.reshape(M, E)

    if compute_dtype is not None:
        x2 = x2.astype(compute_dtype)
        w1 = w1.astype(compute_dtype)
        w2 = w2.astype(compute_dtype)
    b1_2 = b1.reshape(1, F)
    b2_2 = b2.reshape(1, E)

    x_bytes = jnp.dtype(x2.dtype).itemsize
    w_bytes = jnp.dtype(w1.dtype).itemsize
    budget = _vmem_budget_bytes()

    if tile_m is None or tile_f is None:
        auto_tm, auto_tf, _ = _choose_tiles(M, E, F, x_bytes, w_bytes, budget)
        tile_m = tile_m if tile_m is not None else auto_tm
        tile_f = tile_f if tile_f is not None else auto_tf
    assert F % tile_f == 0, "tile_f must divide mlp_dim"

    # Ragged-M support: pad rows up to a multiple of tile_m (padded rows are
    # computed then sliced off; keeps tiles large, aligned and lane-dense).
    M_pad = _round_up(M, tile_m)
    if M_pad != M:
        x2 = jnp.pad(x2, ((0, M_pad - M), (0, 0)))

    grid = (M_pad // tile_m, F // tile_f)

    vmem_limit = int(min(budget,
                         max(2 * _vmem_estimate(tile_m, tile_f, E, x_bytes, w_bytes),
                             32 * 1024 * 1024)))

    out2 = pl.pallas_call(
        _mlp_kernel,
        out_shape=jax.ShapeDtypeStruct((M_pad, E), out_dtype),
        grid_spec=pltpu.PrefetchScalarGridSpec(
            num_scalar_prefetch=0,
            grid=grid,
            in_specs=[
                pl.BlockSpec((tile_m, E), lambda i, f: (i, 0)),   # x rows (resident over f)
                pl.BlockSpec((E, tile_f), lambda i, f: (0, f)),   # w1 chunk (constant over i)
                pl.BlockSpec((1, tile_f), lambda i, f: (0, f)),   # b1 chunk
                pl.BlockSpec((tile_f, E), lambda i, f: (f, 0)),   # w2 chunk (constant over i)
                pl.BlockSpec((1, E), lambda i, f: (0, 0)),        # b2 (resident)
            ],
            out_specs=pl.BlockSpec((tile_m, E), lambda i, f: (i, 0)),
            scratch_shapes=[pltpu.VMEM((tile_m, E), jnp.float32)],
        ),
        compiler_params=pltpu.CompilerParams(
            dimension_semantics=("parallel", "arbitrary"),
            vmem_limit_bytes=vmem_limit,
        ),
    )(x2, w1, b1_2, w2, b2_2)

    if M_pad != M:
        out2 = out2[:M]
    return out2.reshape(orig_shape)


def _reference_mlp(x, w1, b1, w2, b2):
    h = jnp.matmul(x, w1, precision=jax.lax.Precision.HIGHEST) + b1
    h = jax.nn.gelu(h, approximate=False)   # exact erf GELU == torch.nn.GELU() default
    return jnp.matmul(h, w2, precision=jax.lax.Precision.HIGHEST) + b2


if __name__ == "__main__":
    key = jax.random.PRNGKey(0)
    E, F = 32, 128                                   # small (embedding_dim, mlp_dim)
    kx, k1, kb1, k2, kb2, kxr = jax.random.split(key, 6)

    w1 = jax.random.normal(k1, (E, F), dtype=jnp.float32) / math.sqrt(float(E))
    b1 = 0.1 * jax.random.normal(kb1, (F,), dtype=jnp.float32)
    w2 = jax.random.normal(k2, (F, E), dtype=jnp.float32) / math.sqrt(float(F))
    b2 = 0.1 * jax.random.normal(kb2, (E,), dtype=jnp.float32)

    # 1) main f32 check: (batch=2, seq=8, E=32)
    x = jax.random.normal(kx, (2, 8, E), dtype=jnp.float32)
    out = jax.block_until_ready(mlp_block(x, w1, b1, w2, b2))
    ref = _reference_mlp(x, w1, b1, w2, b2)
    assert out.shape == x.shape and out.dtype == x.dtype
    assert jnp.allclose(out, ref, atol=1e-3, rtol=1e-3), "f32 mismatch vs reference"

    # 2) ragged row count (exercises M padding): (3, 7, E) -> M = 21
    xr = jax.random.normal(kxr, (3, 7, E), dtype=jnp.float32)
    outr = jax.block_until_ready(mlp_block(xr, w1, b1, w2, b2))
    refr = _reference_mlp(xr, w1, b1, w2, b2)
    assert outr.shape == xr.shape
    assert jnp.allclose(outr, refr, atol=1e-3, rtol=1e-3), "ragged-M mismatch vs reference"

    # 3) bf16 MXU operands with f32 accumulation (production fast path)
    outb = jax.block_until_ready(mlp_block(x, w1, b1, w2, b2,
                                           compute_dtype=jnp.bfloat16))
    assert outb.shape == x.shape and outb.dtype == x.dtype
    assert jnp.allclose(outb, ref, atol=1e-1, rtol=1e-1), "bf16 mismatch vs reference"

    print("KERNEL_OK")
</pallas_src>

<mosaic_0001>
module attributes {stable_mosaic.version = 11 : i64} {
  func.func @_mlp_kernel(%arg0: i32, %arg1: i32, %arg2: memref<16x32xf32, #tpu.memory_space<vmem>>, %arg3: memref<32x128xf32, #tpu.memory_space<vmem>>, %arg4: memref<1x128xf32, #tpu.memory_space<vmem>>, %arg5: memref<128x32xf32, #tpu.memory_space<vmem>>, %arg6: memref<1x32xf32, #tpu.memory_space<vmem>>, %arg7: memref<16x32xf32, #tpu.memory_space<vmem>>, %arg8: memref<16x32xf32, #tpu.memory_space<vmem>>) attributes {dimension_semantics = [#tpu.dimension_semantics<parallel>, #tpu.dimension_semantics<arbitrary>], iteration_bounds = array<i64: 1, 1>, scalar_prefetch = 0 : i64, scratch_operands = 1 : i64, tpu.core_type = #tpu.core_type<tc>, window_params = [{transform_indices = @transform_0, window_bounds = array<i64: 16, 32>}, {transform_indices = @transform_1, window_bounds = array<i64: 32, 128>}, {transform_indices = @transform_2, window_bounds = array<i64: 1, 128>}, {transform_indices = @transform_3, window_bounds = array<i64: 128, 32>}, {pipeline_mode = #tpu.pipeline_mode<synchronous>, transform_indices = @transform_4, window_bounds = array<i64: 1, 32>}, {transform_indices = @transform_5, window_bounds = array<i64: 16, 32>}]} {
    %c0_i32 = arith.constant 0 : i32
    %0 = arith.cmpi eq, %arg1, %c0_i32 : i32
    %1 = arith.extui %0 : i1 to i32
    %c0_i32_0 = arith.constant 0 : i32
    %2 = arith.cmpi ne, %1, %c0_i32_0 : i32
    scf.if %2 {
      %c0_30 = arith.constant 0 : index
      %c0_31 = arith.constant 0 : index
      %57 = vector.load %arg6[%c0_30, %c0_31] : memref<1x32xf32, #tpu.memory_space<vmem>>, vector<1x32xf32>
      %58 = vector.shape_cast %57 : vector<1x32xf32> to vector<1x32xf32>
      %59 = vector.broadcast %58 : vector<1x32xf32> to vector<16x32xf32>
      %c0_32 = arith.constant 0 : index
      %c0_33 = arith.constant 0 : index
      %60 = vector.load %arg8[%c0_32, %c0_33] : memref<16x32xf32, #tpu.memory_space<vmem>>, vector<16x32xf32>
      tpu.vector_store %arg8[%c0_32, %c0_33], %59 {strides = array<i32>} : memref<16x32xf32, #tpu.memory_space<vmem>>, vector<16x32xf32>,
    } else {
    }
    %c0 = arith.constant 0 : index
    %c0_1 = arith.constant 0 : index
    %3 = vector.load %arg2[%c0, %c0_1] : memref<16x32xf32, #tpu.memory_space<vmem>>, vector<16x32xf32>
    %c0_2 = arith.constant 0 : index
    %c0_3 = arith.constant 0 : index
    %4 = vector.load %arg3[%c0_2, %c0_3] : memref<32x128xf32, #tpu.memory_space<vmem>>, vector<32x128xf32>
    %cst = arith.constant dense<0.000000e+00> : vector<16x128xf32>
    %5 = tpu.matmul %3, %4, %cst {dimension_numbers = #tpu.dot_dimension_numbers<[1], [0], [0], [1], [0, 0, 1, 1], [], []>} : vector<16x32xf32>, vector<32x128xf32>, vector<16x128xf32> -> vector<16x128xf32>
    %c0_4 = arith.constant 0 : index
    %c0_5 = arith.constant 0 : index
    %6 = vector.load %arg4[%c0_4, %c0_5] : memref<1x128xf32, #tpu.memory_space<vmem>>, vector<1x128xf32>
    %7 = vector.broadcast %6 : vector<1x128xf32> to vector<16x128xf32>
    %8 = arith.addf %5, %7 : vector<16x128xf32>
    %cst_6 = arith.constant 5.000000e-01 : f32
    %9 = vector.broadcast %cst_6 : f32 to vector<16x128xf32>
    %10 = arith.mulf %9, %8 : vector<16x128xf32>
    %cst_7 = arith.constant 0.707106769 : f32
    %11 = vector.broadcast %cst_7 : f32 to vector<16x128xf32>
    %12 = arith.mulf %8, %11 : vector<16x128xf32>
    %13 = math.absf %12 : vector<16x128xf32>
    %cst_8 = arith.constant 0.327591091 : f32
    %14 = vector.broadcast %cst_8 : f32 to vector<16x128xf32>
    %15 = arith.mulf %14, %13 : vector<16x128xf32>
    %cst_9 = arith.constant 1.000000e+00 : f32
    %16 = vector.broadcast %cst_9 : f32 to vector<16x128xf32>
    %17 = arith.addf %16, %15 : vector<16x128xf32>
    %cst_10 = arith.constant 1.000000e+00 : f32
    %18 = vector.broadcast %cst_10 : f32 to vector<16x128xf32>
    %19 = arith.divf %18, %17 : vector<16x128xf32>
    %cst_11 = arith.constant 1.06140542 : f32
    %20 = vector.broadcast %cst_11 : f32 to vector<16x128xf32>
    %21 = arith.mulf %20, %19 : vector<16x128xf32>
    %cst_12 = arith.constant -1.45315206 : f32
    %22 = vector.broadcast %cst_12 : f32 to vector<16x128xf32>
    %23 = arith.addf %21, %22 : vector<16x128xf32>
    %24 = arith.mulf %23, %19 : vector<16x128xf32>
    %cst_13 = arith.constant 1.42141378 : f32
    %25 = vector.broadcast %cst_13 : f32 to vector<16x128xf32>
    %26 = arith.addf %24, %25 : vector<16x128xf32>
    %27 = arith.mulf %26, %19 : vector<16x128xf32>
    %cst_14 = arith.constant -0.284496725 : f32
    %28 = vector.broadcast %cst_14 : f32 to vector<16x128xf32>
    %29 = arith.addf %27, %28 : vector<16x128xf32>
    %30 = arith.mulf %29, %19 : vector<16x128xf32>
    %cst_15 = arith.constant 0.254829586 : f32
    %31 = vector.broadcast %cst_15 : f32 to vector<16x128xf32>
    %32 = arith.addf %30, %31 : vector<16x128xf32>
    %33 = arith.mulf %32, %19 : vector<16x128xf32>
    %cst_16 = arith.constant 0.000000e+00 : f32
    %34 = vector.broadcast %cst_16 : f32 to vector<16x128xf32>
    %35 = arith.subf %34, %13 : vector<16x128xf32>
    %36 = arith.mulf %35, %13 : vector<16x128xf32>
    %37 = math.exp %36 : vector<16x128xf32>
    %38 = arith.mulf %33, %37 : vector<16x128xf32>
    %cst_17 = arith.constant 1.000000e+00 : f32
    %39 = vector.broadcast %cst_17 : f32 to vector<16x128xf32>
    %40 = arith.subf %39, %38 : vector<16x128xf32>
    %cst_18 = arith.constant 0.000000e+00 : f32
    %41 = vector.broadcast %cst_18 : f32 to vector<16x128xf32>
    %42 = arith.cmpf olt, %12, %41 : vector<16x128xf32>
    %cst_19 = arith.constant 0.000000e+00 : f32
    %43 = vector.broadcast %cst_19 : f32 to vector<16x128xf32>
    %44 = arith.subf %43, %40 : vector<16x128xf32>
    %45 = arith.select %42, %44, %40 : vector<16x128xi1>, vector<16x128xf32>
    %cst_20 = arith.constant 1.000000e+00 : f32
    %46 = vector.broadcast %cst_20 : f32 to vector<16x128xf32>
    %47 = arith.addf %46, %45 : vector<16x128xf32>
    %48 = arith.mulf %10, %47 : vector<16x128xf32>
    %c0_21 = arith.constant 0 : index
    %c0_22 = arith.constant 0 : index
    %49 = vector.load %arg8[%c0_21, %c0_22] : memref<16x32xf32, #tpu.memory_space<vmem>>, vector<16x32xf32>
    %c0_23 = arith.constant 0 : index
    %c0_24 = arith.constant 0 : index
    %50 = vector.load %arg5[%c0_23, %c0_24] : memref<128x32xf32, #tpu.memory_space<vmem>>, vector<128x32xf32>
    %cst_25 = arith.constant dense<0.000000e+00> : vector<16x32xf32>
    %51 = tpu.matmul %48, %50, %cst_25 {dimension_numbers = #tpu.dot_dimension_numbers<[1], [0], [0], [1], [0, 0, 1, 1], [], []>} : vector<16x128xf32>, vector<128x32xf32>, vector<16x32xf32> -> vector<16x32xf32>
    %52 = arith.addf %49, %51 : vector<16x32xf32>
    %c0_26 = arith.constant 0 : index
    %c0_27 = arith.constant 0 : index
    %53 = vector.load %arg8[%c0_26, %c0_27] : memref<16x32xf32, #tpu.memory_space<vmem>>, vector<16x32xf32>
    tpu.vector_store %arg8[%c0_26, %c0_27], %52 {strides = array<i32>} : memref<16x32xf32, #tpu.memory_space<vmem>>, vector<16x32xf32>,
    %c0_i32_28 = arith.constant 0 : i32
    %54 = arith.cmpi eq, %arg1, %c0_i32_28 : i32
    %55 = arith.extui %54 : i1 to i32
    %c0_i32_29 = arith.constant 0 : i32
    %56 = arith.cmpi ne, %55, %c0_i32_29 : i32
    scf.if %56 {
      %c0_30 = arith.constant 0 : index
      %c0_31 = arith.constant 0 : index
      %57 = vector.load %arg8[%c0_30, %c0_31] : memref<16x32xf32, #tpu.memory_space<vmem>>, vector<16x32xf32>
      %c0_32 = arith.constant 0 : index
      %c0_33 = arith.constant 0 : index
      %58 = vector.load %arg7[%c0_32, %c0_33] : memref<16x32xf32, #tpu.memory_space<vmem>>, vector<16x32xf32>
      tpu.vector_store %arg7[%c0_32, %c0_33], %57 {strides = array<i32>} : memref<16x32xf32, #tpu.memory_space<vmem>>, vector<16x32xf32>,
    } else {
    }
    return
  }
  func.func @transform_0(%arg0: i32, %arg1: i32) -> (i32, i32) {
    %c0_i32 = arith.constant 0 : i32
    %c0_i32_0 = arith.constant 0 : i32
    return %arg0, %c0_i32 : i32, i32
  }
  func.func @transform_1(%arg0: i32, %arg1: i32) -> (i32, i32) {
    %c0_i32 = arith.constant 0 : i32
    %c0_i32_0 = arith.constant 0 : i32
    return %c0_i32, %arg1 : i32, i32
  }
  func.func @transform_2(%arg0: i32, %arg1: i32) -> (i32, i32) {
    %c0_i32 = arith.constant 0 : i32
    %c0_i32_0 = arith.constant 0 : i32
    return %c0_i32, %arg1 : i32, i32
  }
  func.func @transform_3(%arg0: i32, %arg1: i32) -> (i32, i32) {
    %c0_i32 = arith.constant 0 : i32
    %c0_i32_0 = arith.constant 0 : i32
    return %arg1, %c0_i32 : i32, i32
  }
  func.func @transform_4(%arg0: i32, %arg1: i32) -> (i32, i32) {
    %c0_i32 = arith.constant 0 : i32
    %c0_i32_0 = arith.constant 0 : i32
    %c0_i32_1 = arith.constant 0 : i32
    return %c0_i32, %c0_i32_0 : i32, i32
  }
  func.func @transform_5(%arg0: i32, %arg1: i32) -> (i32, i32) {
    %c0_i32 = arith.constant 0 : i32
    %c0_i32_0 = arith.constant 0 : i32
    return %arg0, %c0_i32 : i32, i32
  }
}

</mosaic_0001>

<bundles_post_ra>
// kernel: tpu_custom_call.1
= control target key start
LH: loop header
LB: loop body
LE: loop exit
PB: predicated region body
PF: predicated region fallthrough
CT: control target
= control target key end

     0   :  { %vm32_vm0 = vcmask 261120   ;;  %s527_s0 = inlined_call_operand.vmem [shape: f32[16,32], index: 0, kind: input, shape index: {}]   ;;  %s528_s1 = inlined_call_operand.vmem [shape: f32[32,128], index: 1, kind: input, shape index: {}]   ;;  %s529_s2 = inlined_call_operand.vmem [shape: f32[1,128], index: 2, kind: input, shape index: {}]   ;;  %s530_s3 = inlined_call_operand.vmem [shape: f32[128,32], index: 3, kind: input, shape index: {}]   ;;  %s531_s4 = inlined_call_operand.vmem [shape: f32[1,32], index: 4, kind: input, shape index: {}]   ;;  %s532_s5 = inlined_call_operand.hbm [shape: f32[16,32], index: 5, kind: output, shape index: {}]  }
   0x1   :  { %v40_v0 = vld [vmem:[%s528_s1 + $0x18] sm:$0xff]  ;;  %v39_v1 = vld [vmem:[%s528_s1 + $0x10] sm:$0xff]  ;;  %v35_v2 = vld [vmem:[%s527_s0] sm:$0xff] }
   0x2   :  { %332 = vmatprep.subr.mxu0 %v40_v0  ;;  %v38_v3 = vld [vmem:[%s528_s1 + $0x8] sm:$0xff]  ;;  %340 = vmatprep.mubr.msk.f32.mxu0 %vm32_vm0, %v35_v2 }
   0x3   :  { %333 = vmatpush3.msra.mxu0 %v40_v0 }
   0x4   :  { %10 = vsyncpa [#allocation4], 0  ;;  %334 = vmatprep.subr.mxu0 %v39_v1  ;;  %v37_v4 = vld [vmem:[%s528_s1] sm:$0xff]  ;;  %v36_v5 = vld [vmem:[%s527_s0 + $0x8] sm:$0xff] }
   0x5   :  { %335 = vmatpush3.msra.mxu0 %v39_v1  ;;  %v201_v6 = vld [vmem:[%s530_s3 + $0x78] sm:$0xff]  ;;  %v200_v7 = vld [vmem:[%s530_s3 + $0x70] sm:$0xff]  ;;  %v199_v8 = vld [vmem:[%s530_s3 + $0x68] sm:$0xff] }
   0x6   :  { %336 = vmatprep.subr.mxu0 %v38_v3  ;;  %343 = vmatprep.subr.mxu1 %v201_v6  ;;  %v198_v9 = vld [vmem:[%s530_s3 + $0x60] sm:$0xff]  ;;  %v197_v10 = vld [vmem:[%s530_s3 + $0x58] sm:$0xff]  ;;  %v196_v11 = vld [vmem:[%s530_s3 + $0x50] sm:$0xff] }
   0x7   :  { %337 = vmatpush3.msra.mxu0 %v38_v3  ;;  %344 = vmatpush3.msra.mxu1 %v201_v6  ;;  %v195_v12 = vld [vmem:[%s530_s3 + $0x48] sm:$0xff]  ;;  %v194_v13 = vld [vmem:[%s530_s3 + $0x40] sm:$0xff]  ;;  %v193_v14 = vld [vmem:[%s530_s3 + $0x38] sm:$0xff] }
   0x8   :  { %338 = vmatprep.subr.mxu0 %v37_v4  ;;  %345 = vmatprep.subr.mxu1 %v200_v7  ;;  %v192_v15 = vld [vmem:[%s530_s3 + $0x30] sm:$0xff]  ;;  %v191_v16 = vld [vmem:[%s530_s3 + $0x28] sm:$0xff]  ;;  %v190_v17 = vld [vmem:[%s530_s3 + $0x20] sm:$0xff] }
   0x9   :  { %339 = vmatpush3.msra.mxu0 %v37_v4  ;;  %346 = vmatpush3.msra.mxu1 %v200_v7  ;;  %v189_v18 = vld [vmem:[%s530_s3 + $0x18] sm:$0xff]  ;;  %v188_v19 = vld [vmem:[%s530_s3 + $0x10] sm:$0xff]  ;;  %v187_v20 = vld [vmem:[%s530_s3 + $0x8] sm:$0xff] }
   0xa   :  { %341 = vmatmul.mubr.msk.f32.vlgmr.msra.gmra.mxu0 %vm32_vm0, %v36_v5  ;;  %347 = vmatprep.subr.mxu1 %v199_v8  ;;  %v186_v21 = vld [vmem:[%s530_s3] sm:$0xff] }
   0xb   :  { %348 = vmatpush3.msra.mxu1 %v199_v8  ;;  %v304_v22 = vld [vmem:[%s531_s4] ss:$0 sm:$0xff] }
   0xc   :  { %349 = vmatprep.subr.mxu1 %v198_v9  ;;  %34 = vst.msk [vmem:[#allocation2 + $0x8] sm:$0xff] %vm32_vm0, %v304_v22  ;;  %33 = vst.msk [vmem:[#allocation2] sm:$0xff] %vm32_vm0, %v304_v22  ;;  %v305_v23 = vld [vmem:[%s529_s2] ss:$0 sm:$0xff]  ;;  %s411_s2 = smov [#allocation3]  }
   0xd   :  { %350 = vmatpush3.msra.mxu1 %v198_v9  ;;  %s293_s3 = sshll.u32 %s411_s2, 4  ;;  %s294_s3 = int_to_ptr.vmem [resolvable:$true] %s293_s3 }
   0xe   :  { %351 = vmatprep.subr.mxu1 %v197_v10  ;;  %s389_s4 = scalar_lea.vmem %s294_s3, 256  ;;  %p394_p1 = scmp.lt.s32.totalorder %s294_s3, %s294_s3 }
   0xf   :  { %352 = vmatpush3.msra.mxu1 %v197_v10  ;;  %p390_p0 = scmp.ne.s32.totalorder %s294_s3, %s389_s4  ;;  %p395_p2 = scmp.lt.s32.totalorder %s389_s4, %s389_s4 }
  0x10   :  { %353 = vmatprep.subr.mxu1 %v196_v11 }
  0x11   :  { %354 = vmatpush3.msra.mxu1 %v196_v11  ;;  %p396_p3 = por %p395_p2, %p394_p1 }
  0x12   :  { %355 = vmatprep.subr.mxu1 %v195_v12 }
  0x13   :  { %356 = vmatpush3.msra.mxu1 %v195_v12  ;;  %p397_p4 = pnand %p396_p3, %p390_p0 }
  0x14   :  { %357 = vmatprep.subr.mxu1 %v194_v13 }
  0x15   :  { %358 = vmatpush3.msra.mxu1 %v194_v13 }
  0x16   :  { %359 = vmatprep.subr.mxu1 %v193_v14 }
  0x17   :  { %360 = vmatpush3.msra.mxu1 %v193_v14  ;;  %v185_v14 = vld [vmem:[#allocation2 + $0x8] sm:$0xff] }
  0x18   :  { %361 = vmatprep.subr.mxu1 %v192_v15 }
  0x19   :  { %362 = vmatpush3.msra.mxu1 %v192_v15 }
  0x1a   :  { %363 = vmatprep.subr.mxu1 %v191_v16 }
  0x1b   :  { %364 = vmatpush3.msra.mxu1 %v191_v16  ;;  %v184_v16 = vld [vmem:[#allocation2] sm:$0xff] }
  0x1c   :  { %365 = vmatprep.subr.mxu1 %v190_v17 }
  0x1d   :  { %366 = vmatpush3.msra.mxu1 %v190_v17 }
  0x1e   :  { %367 = vmatprep.subr.mxu1 %v189_v18 }
  0x1f   :  { %368 = vmatpush3.msra.mxu1 %v189_v18 }
  0x20   :  { %369 = vmatprep.subr.mxu1 %v188_v19 }
  0x21   :  { %370 = vmatpush3.msra.mxu1 %v188_v19 }
  0x22   :  { %371 = vmatprep.subr.mxu1 %v187_v20 }
  0x23   :  { %372 = vmatpush3.msra.mxu1 %v187_v20 }
  0x24   :  { %373 = vmatprep.subr.mxu1 %v186_v21 }
  0x25   :  { %374 = vmatpush3.msra.mxu1 %v186_v21 }
  0xca   :  { %v342_v24 = vpop.f32.mrf.mxu0 }
  0xcb   :  { %v127_v25 = vadd.f32 %v342_v24, %v305_v23 }
  0xcc   :  { %v121_v26 = vpop.f32.mrf.mxu0 }
  0xcd   :  { %v133_v27 = vmul.f32 0.70710677, %v127_v25  ;;  %v122_v28 = vadd.f32 %v305_v23, %v121_v26  ;;  %v131_v11 = vmul.f32 0.5, %v127_v25 }
  0xcf   :  { %v135_v29 = vand.u32 2147483647, %v133_v27  ;;  %v132_v30 = vmul.f32 0.70710677, %v122_v28  ;;  %vm175_vm1 = vcmp.lt.f32.partialorder %v133_v27, 0.0  ;;  %v130_v9 = vmul.f32 0.5, %v122_v28 }
  0xd1   :  { %v137_v31 = vmul.f32 0.3275911, %v135_v29  ;;  %v134_v32 = vand.u32 2147483647, %v132_v30  ;;  %v163_v36 = vsub.f32 0.0, %v135_v29  ;;  %vm174_vm2 = vcmp.lt.f32.partialorder %v132_v30, 0.0 }
  0xd3   :  { %v139_v33 = vadd.f32 1.0, %v137_v31  ;;  %v136_v34 = vmul.f32 0.3275911, %v134_v32  ;;  %v162_v37 = vsub.f32 0.0, %v134_v32  ;;  %v165_v38 = vmul.f32 %v163_v36, %v135_v29 }
  0xd5   :  { %381 = vrcp.f32 %v139_v33  ;;  %v138_v35 = vadd.f32 1.0, %v136_v34  ;;  %v164_v40 = vmul.f32 %v162_v37, %v134_v32  ;;  %v168_v41 = vmul.f32 1.442695, %v165_v38 }
  0xd7   :  { %383 = vrcp.f32 %v138_v35  ;;  %v166_v45 = vmul.f32 1.442695, %v164_v40 }
  0xd8   :  { %385 = vpow2.f32 %v168_v41 }
  0xd9   :  { %387 = vpow2.f32 %v166_v45 }
  0xe2   :  { %v382_v39 = vpop.eup %381 }
  0xe3   :  { %v145_v42 = vmul.f32 1.0614054, %v382_v39 }
  0xe4   :  { %v384_v43 = vpop.eup %383 }
  0xe5   :  { %v147_v44 = vadd.f32 -1.4531521, %v145_v42  ;;  %v144_v46 = vmul.f32 1.0614054, %v384_v43  ;;  %v386_v60 = vpop.eup %385 }
  0xe6   :  { %v388_v0 = vpop.eup %387 }
  0xe7   :  { %v149_v47 = vmul.f32 %v382_v39, %v147_v44  ;;  %v146_v48 = vadd.f32 -1.4531521, %v144_v46 }
  0xe9   :  { %v151_v49 = vadd.f32 1.4214138, %v149_v47  ;;  %v148_v50 = vmul.f32 %v384_v43, %v146_v48 }
  0xeb   :  { %v153_v51 = vmul.f32 %v382_v39, %v151_v49  ;;  %v150_v52 = vadd.f32 1.4214138, %v148_v50 }
  0xed   :  { %v155_v53 = vadd.f32 -0.28449672, %v153_v51  ;;  %v152_v54 = vmul.f32 %v384_v43, %v150_v52 }
  0xef   :  { %v157_v55 = vmul.f32 %v382_v39, %v155_v53  ;;  %v154_v56 = vadd.f32 -0.28449672, %v152_v54 }
  0xf1   :  { %v159_v57 = vadd.f32 0.2548296, %v157_v55  ;;  %v156_v58 = vmul.f32 %v384_v43, %v154_v56 }
  0xf3   :  { %v161_v59 = vmul.f32 %v382_v39, %v159_v57  ;;  %v158_v61 = vadd.f32 0.2548296, %v156_v58 }
  0xf5   :  { %v171_v62 = vmul.f32 %v386_v60, %v161_v59  ;;  %v160_v63 = vmul.f32 %v384_v43, %v158_v61 }
  0xf7   :  { %v173_v1 = vsub.f32 1.0, %v171_v62  ;;  %v170_v2 = vmul.f32 %v388_v0, %v160_v63 }
  0xf9   :  { %v177_v3 = vsub.f32 0.0, %v173_v1  ;;  %v172_v4 = vsub.f32 1.0, %v170_v2 }
  0xfb   :  { %v179_v5 = vsel %vm175_vm1, %v177_v3, %v173_v1  ;;  %v176_v6 = vsub.f32 0.0, %v172_v4 }
  0xfc   :  { %v181_v8 = vadd.f32 1.0, %v179_v5 }
  0xfd   :  { %v178_v7 = vsel %vm174_vm2, %v176_v6, %v172_v4 }
  0xfe   :  { %v180_v10 = vadd.f32 1.0, %v178_v7  ;;  %v183_v13 = vmul.f32 %v181_v8, %v131_v11 }
 0x100   :  { %v182_v12 = vmul.f32 %v180_v10, %v130_v9 }
 0x102   :  { %375 = vmatprep.mubr.f32.mxu1 %v182_v12 }
 0x103   :  { %376 = vmatmul.mubr.f32.vlgmr.msra.gmra.mxu1 %v183_v13 }
 0x1c3   :  { %v377_v15 = vpop.f32.mrf.mxu1 }
 0x1c4   :  { %v278_v17 = vadd.f32 %v377_v15, %v185_v14 }
 0x1c5   :  { %v268_v18 = vpop.f32.mrf.mxu1 }
 0x1c6   :  { %280 = vst.msk [vmem:[#allocation2 + $0x8] sm:$0xff] %vm32_vm0, %v278_v17  ;;  %v277_v19 = vadd.f32 %v268_v18, %v184_v16 }
 0x1c8   :  { %279 = vst.msk [vmem:[#allocation2] sm:$0xff] %vm32_vm0, %v277_v19 }
 0x1cd   :  { %v285_v20 = vld [vmem:[#allocation2 + $0x8] sm:$0xff] }
 0x1ce   :  { %287 = vst.msk [vmem:[#allocation3 + $0x8] sm:$0xff] %vm32_vm0, %v285_v20 }
 0x1cf   :  { %v284_v21 = vld [vmem:[#allocation2] sm:$0xff] }
 0x1d0   :  { %286 = vst.msk [vmem:[#allocation3] sm:$0xff] %vm32_vm0, %v284_v21 }
 0x1d1   :  { %400 = shalt.err (!%p397_p4)
}
 0x1d2   :  { %s412_s12 = smov 128   ;;  %s413_s13 = smov 8  }
 0x1d3   :  { %299 = dma.vmem_to_hbm [thread:$0]  %s294_s3, 256, %s532_s5, [#allocation4], %s412_s12, %s412_s12, %s413_s13  }
 0x1d4   :  { %409 = dma.done.wait [#allocation4], 256  }
 0x1d5   :  { %410 = vsyncadd [#allocation4], 4294967040 }
 0x1d6   :  { %303 = vsyncpa [#allocation4], 1 }

</bundles_post_ra>
